<compile_context>
chip_gen: v5e
topology: v5e:2x2
jax: 0.10.0
libtpu: 0.0.40
codegen_flags: <defaults>
</compile_context>

<pallas_src>
import math

import jax
import jax.numpy as jnp
from jax import lax
from jax.experimental import pallas as pl
from jax.experimental.pallas import tpu as pltpu


_LANE = 128     # lane width (last-dim tiling quantum)
_SUBLANE = 8    # sublane quantum for f32


def _round_up(v, m):
    return int(math.ceil(v / m) * m)


def _conv_matmul_kernel(p_ref, w_ref, b_ref, o_ref, acc_ref):
    """One (tile_m, tile_n) output tile, accumulated over the K grid axis."""
    k = pl.program_id(2)

    @pl.when(k == 0)
    def _():
        acc_ref[...] = jnp.zeros_like(acc_ref)

    acc_ref[...] += jnp.dot(
        p_ref[...], w_ref[...], preferred_element_type=jnp.float32
    )

    @pl.when(k == pl.num_programs(2) - 1)
    def _():
        o_ref[...] = (acc_ref[...] + b_ref[...]).astype(o_ref.dtype)


def _choose_tile_n(cout_pad):
    # Lane-dense Cout tile; cap so the weight slab stays modest (portable to
    # v7x's 64 MiB VMEM).  cout_pad is always a multiple of 128.
    if cout_pad <= 512:
        return cout_pad
    return 256 if cout_pad % 256 == 0 else _LANE


def _choose_tile_k(k_pad):
    # Contraction tile; full K when small, otherwise the largest power-of-two
    # multiple of 128 that divides k_pad.
    if k_pad <= 2048:
        return k_pad
    for tk in (1024, 512, 256, 128):
        if k_pad % tk == 0:
            return tk
    return _LANE


def _choose_tile_m(m, tile_k, tile_n, vmem_budget_bytes=24 << 20):
    # Largest M tile whose working set (double-buffered inputs/output + f32
    # accumulator) fits the budget — stays under the 32 MiB scoped-VMEM
    # default on all generations.
    if m < _LANE:
        return _round_up(max(m, 1), _SUBLANE)
    for tm in (1024, 512, 256, 128):
        working = (
            2 * 4 * (tm * tile_k + tile_k * tile_n + tm * tile_n)  # dbl-buffered
            + 4 * tm * tile_n                                      # accumulator
        )
        if tm <= m and working <= vmem_budget_bytes:
            return tm
    return _LANE


def ep_forward(x, weight, bias):
    """Forward pass of EP: y = Conv2d(x) with kernel (1, node_dim), NCHW."""
    N, Cin, H, W = x.shape
    Cout, Cin_w, kh, node_dim = weight.shape
    assert Cin == Cin_w and kh == 1
    Wout = W - node_dim + 1
    M = N * H * Wout
    K = Cin * node_dim

    # --- glue: im2col patch extraction (no Python unroll over Wout) ---
    if Wout == 1:
        # Common EP case (W == node_dim): pure layout change, no inflation.
        patches = jnp.transpose(x, (0, 2, 1, 3)).reshape(M, K)
    else:
        # TODO(synk): fuse the window gather into the kernel (Element-offset
        # BlockSpec over the K axis) to avoid the node_dim-fold HBM inflation
        # of the im2col matrix when Wout > 1.
        win = (jnp.arange(Wout)[:, None] + jnp.arange(node_dim)[None, :]).reshape(-1)
        patches = jnp.take(x, win, axis=3).reshape(N, Cin, H, Wout, node_dim)
        patches = jnp.transpose(patches, (0, 2, 3, 1, 4)).reshape(M, K)

    w2d = weight.reshape(Cout, K).T          # (K, Cout), Cin-major / node_dim-minor
    b2d = bias.reshape(1, Cout)

    # --- pad to MXU/lane-friendly shapes (zero pads are numerically inert) ---
    K_pad = _round_up(K, _LANE)
    Cout_pad = _round_up(Cout, _LANE)
    tile_n = _choose_tile_n(Cout_pad)
    tile_k = _choose_tile_k(K_pad)
    tile_m = _choose_tile_m(M, tile_k, tile_n)
    M_pad = _round_up(M, tile_m)

    if (M_pad, K_pad) != (M, K):
        patches = jnp.pad(patches, ((0, M_pad - M), (0, K_pad - K)))
    if (K_pad, Cout_pad) != (K, Cout):
        w2d = jnp.pad(w2d, ((0, K_pad - K), (0, Cout_pad - Cout)))
    if Cout_pad != Cout:
        b2d = jnp.pad(b2d, ((0, 0), (0, Cout_pad - Cout)))

    grid = (M_pad // tile_m, Cout_pad // tile_n, K_pad // tile_k)

    cost = pl.CostEstimate(
        flops=2 * M_pad * K_pad * Cout_pad,
        transcendentals=0,
        bytes_accessed=4 * (M_pad * K_pad + K_pad * Cout_pad + M_pad * Cout_pad),
    )

    out = pl.pallas_call(
        _conv_matmul_kernel,
        out_shape=jax.ShapeDtypeStruct((M_pad, Cout_pad), x.dtype),
        grid_spec=pltpu.PrefetchScalarGridSpec(
            num_scalar_prefetch=0,
            grid=grid,
            in_specs=[
                pl.BlockSpec((tile_m, tile_k), lambda i, j, k: (i, k)),  # patches
                pl.BlockSpec((tile_k, tile_n), lambda i, j, k: (k, j)),  # weight
                pl.BlockSpec((1, tile_n), lambda i, j, k: (0, j)),       # bias row
            ],
            out_specs=pl.BlockSpec((tile_m, tile_n), lambda i, j, k: (i, j)),
            scratch_shapes=[pltpu.VMEM((tile_m, tile_n), jnp.float32)],
        ),
        compiler_params=pltpu.CompilerParams(
            dimension_semantics=("parallel", "parallel", "arbitrary"),
        ),
        cost_estimate=cost,
    )(patches, w2d, b2d)

    # Strip padding, restore NCHW (module contract returns NCHW).
    out = out[:M, :Cout].reshape(N, H, Wout, Cout)
    return jnp.transpose(out, (0, 3, 1, 2))


def init_ep_params(key, in_dim, out_dim, node_dim):
    """Deterministic init matching EP.__init__ (shapes + custom weight std)."""
    kw, kb = jax.random.split(key)
    std = math.sqrt(4.0 / (node_dim * in_dim + out_dim))
    weight = std * jax.random.normal(
        kw, (out_dim, in_dim, 1, node_dim), dtype=jnp.float32
    )
    fan_in = in_dim * 1 * node_dim
    bound = 1.0 / math.sqrt(fan_in)
    bias = jax.random.uniform(
        kb, (out_dim,), minval=-bound, maxval=bound, dtype=jnp.float32
    )
    return weight, bias


if __name__ == "__main__":
    # Small shapes consistent with EP: x is NCHW with W == node_dim.
    N, in_dim, H, node_dim = 2, 4, 16, 16
    out_dim = 32

    key = jax.random.PRNGKey(0)
    kx, kp = jax.random.split(key)
    x = jax.random.normal(kx, (N, in_dim, H, node_dim), dtype=jnp.float32)
    weight, bias = init_ep_params(kp, in_dim, out_dim, node_dim)

    y = ep_forward(x, weight, bias)
    y = jax.block_until_ready(y)

    # Reference check against XLA's conv (same semantics as nn.Conv2d NCHW/OIHW).
    y_ref = lax.conv_general_dilated(
        x, weight, window_strides=(1, 1), padding="VALID",
        dimension_numbers=("NCHW", "OIHW", "NCHW"),
        precision=lax.Precision.HIGHEST,
    ) + bias.reshape(1, out_dim, 1, 1)

    assert y.shape == (N, out_dim, H, 1), y.shape
    assert jnp.allclose(y, y_ref, atol=1e-5, rtol=1e-5)

    print("KERNEL_OK")
</pallas_src>

<mosaic_0001>
module attributes {stable_mosaic.version = 11 : i64} {
  func.func @_conv_matmul_kernel(%arg0: i32, %arg1: i32, %arg2: i32, %arg3: memref<32x128xf32, #tpu.memory_space<vmem>>, %arg4: memref<128x128xf32, #tpu.memory_space<vmem>>, %arg5: memref<1x128xf32, #tpu.memory_space<vmem>>, %arg6: memref<32x128xf32, #tpu.memory_space<vmem>>, %arg7: memref<32x128xf32, #tpu.memory_space<vmem>>) attributes {dimension_semantics = [#tpu.dimension_semantics<parallel>, #tpu.dimension_semantics<parallel>, #tpu.dimension_semantics<arbitrary>], iteration_bounds = array<i64: 1, 1, 1>, scalar_prefetch = 0 : i64, scratch_operands = 1 : i64, tpu.core_type = #tpu.core_type<tc>, window_params = [{transform_indices = @transform_0, window_bounds = array<i64: 32, 128>}, {transform_indices = @transform_1, window_bounds = array<i64: 128, 128>}, {transform_indices = @transform_2, window_bounds = array<i64: 1, 128>}, {transform_indices = @transform_3, window_bounds = array<i64: 32, 128>}]} {
    %c0_i32 = arith.constant 0 : i32
    %0 = arith.cmpi eq, %arg2, %c0_i32 : i32
    %1 = arith.extui %0 : i1 to i32
    %c0_i32_0 = arith.constant 0 : i32
    %2 = arith.cmpi ne, %1, %c0_i32_0 : i32
    scf.if %2 {
      %cst_10 = arith.constant 0.000000e+00 : f32
      %12 = vector.broadcast %cst_10 : f32 to vector<32x128xf32>
      %c0_11 = arith.constant 0 : index
      %c0_12 = arith.constant 0 : index
      %13 = vector.load %arg7[%c0_11, %c0_12] : memref<32x128xf32, #tpu.memory_space<vmem>>, vector<32x128xf32>
      tpu.vector_store %arg7[%c0_11, %c0_12], %12 {strides = array<i32>} : memref<32x128xf32, #tpu.memory_space<vmem>>, vector<32x128xf32>,
    } else {
    }
    %c0 = arith.constant 0 : index
    %c0_1 = arith.constant 0 : index
    %3 = vector.load %arg7[%c0, %c0_1] : memref<32x128xf32, #tpu.memory_space<vmem>>, vector<32x128xf32>
    %c0_2 = arith.constant 0 : index
    %c0_3 = arith.constant 0 : index
    %4 = vector.load %arg3[%c0_2, %c0_3] : memref<32x128xf32, #tpu.memory_space<vmem>>, vector<32x128xf32>
    %c0_4 = arith.constant 0 : index
    %c0_5 = arith.constant 0 : index
    %5 = vector.load %arg4[%c0_4, %c0_5] : memref<128x128xf32, #tpu.memory_space<vmem>>, vector<128x128xf32>
    %cst = arith.constant dense<0.000000e+00> : vector<32x128xf32>
    %6 = tpu.matmul %4, %5, %cst {dimension_numbers = #tpu.dot_dimension_numbers<[1], [0], [0], [1], [0, 0, 1, 1], [], []>} : vector<32x128xf32>, vector<128x128xf32>, vector<32x128xf32> -> vector<32x128xf32>
    %7 = arith.addf %3, %6 : vector<32x128xf32>
    %c0_6 = arith.constant 0 : index
    %c0_7 = arith.constant 0 : index
    %8 = vector.load %arg7[%c0_6, %c0_7] : memref<32x128xf32, #tpu.memory_space<vmem>>, vector<32x128xf32>
    tpu.vector_store %arg7[%c0_6, %c0_7], %7 {strides = array<i32>} : memref<32x128xf32, #tpu.memory_space<vmem>>, vector<32x128xf32>,
    %c0_i32_8 = arith.constant 0 : i32
    %9 = arith.cmpi eq, %arg2, %c0_i32_8 : i32
    %10 = arith.extui %9 : i1 to i32
    %c0_i32_9 = arith.constant 0 : i32
    %11 = arith.cmpi ne, %10, %c0_i32_9 : i32
    scf.if %11 {
      %c0_10 = arith.constant 0 : index
      %c0_11 = arith.constant 0 : index
      %12 = vector.load %arg7[%c0_10, %c0_11] : memref<32x128xf32, #tpu.memory_space<vmem>>, vector<32x128xf32>
      %c0_12 = arith.constant 0 : index
      %c0_13 = arith.constant 0 : index
      %13 = vector.load %arg5[%c0_12, %c0_13] : memref<1x128xf32, #tpu.memory_space<vmem>>, vector<1x128xf32>
      %14 = vector.broadcast %13 : vector<1x128xf32> to vector<32x128xf32>
      %15 = arith.addf %12, %14 : vector<32x128xf32>
      %c0_14 = arith.constant 0 : index
      %c0_15 = arith.constant 0 : index
      %16 = vector.load %arg6[%c0_14, %c0_15] : memref<32x128xf32, #tpu.memory_space<vmem>>, vector<32x128xf32>
      tpu.vector_store %arg6[%c0_14, %c0_15], %15 {strides = array<i32>} : memref<32x128xf32, #tpu.memory_space<vmem>>, vector<32x128xf32>,
    } else {
    }
    return
  }
  func.func @transform_0(%arg0: i32, %arg1: i32, %arg2: i32) -> (i32, i32) {
    %c0_i32 = arith.constant 0 : i32
    return %arg0, %arg2 : i32, i32
  }
  func.func @transform_1(%arg0: i32, %arg1: i32, %arg2: i32) -> (i32, i32) {
    %c0_i32 = arith.constant 0 : i32
    return %arg2, %arg1 : i32, i32
  }
  func.func @transform_2(%arg0: i32, %arg1: i32, %arg2: i32) -> (i32, i32) {
    %c0_i32 = arith.constant 0 : i32
    %c0_i32_0 = arith.constant 0 : i32
    return %c0_i32, %arg1 : i32, i32
  }
  func.func @transform_3(%arg0: i32, %arg1: i32, %arg2: i32) -> (i32, i32) {
    %c0_i32 = arith.constant 0 : i32
    return %arg0, %arg1 : i32, i32
  }
}

</mosaic_0001>

<bundles_post_ra>
// kernel: tpu_custom_call.1
= control target key start
LH: loop header
LB: loop body
LE: loop exit
PB: predicated region body
PF: predicated region fallthrough
CT: control target
= control target key end

     0   :  { %8 = vsyncpa [#allocation4], 0  ;;  %s333_s0 = inlined_call_operand.hbm [shape: f32[32,128], index: 0, kind: input, shape index: {}]   ;;  %s334_s1 = inlined_call_operand.hbm [shape: f32[128,128], index: 1, kind: input, shape index: {}]   ;;  %s335_s2 = inlined_call_operand.vmem [shape: f32[1,128], index: 2, kind: input, shape index: {}]   ;;  %s336_s3 = inlined_call_operand.hbm [shape: f32[32,128], index: 3, kind: output, shape index: {}]  }
   0x1   :  { %9 = vsyncpa [#allocation7], 0 }
   0x2   :  { %10 = vsyncpa [#allocation5], 0  ;;  %s15_s14 = sshll.u32 %s333_s0, 4  ;;  %s287_s15 = smov [#allocation3]   ;;  %s16_s14 = int_to_ptr.hbm [resolvable:$true] %s15_s14 }
   0x3   :  { %s17_s16 = sshll.u32 %s287_s15, 4  ;;  %s28_s19 = sshll.u32 %s334_s1, 4  ;;  %s18_s16 = int_to_ptr.vmem [resolvable:$true] %s17_s16  ;;  %s29_s19 = int_to_ptr.hbm [resolvable:$true] %s28_s19 }
   0x4   :  { %s288_s20 = smov 128   ;;  %s289_s21 = smov 8  }
   0x5   :  { %23 = dma.hbm_to_vmem [thread:$0]  %s16_s14, 512, %s18_s16, [#allocation4], %s288_s20, %s288_s20, %s289_s21  }
   0x6   :  { %s290_s22 = smov [#allocation6]  }
   0x7   :  { %s30_s23 = sshll.u32 %s290_s22, 4  ;;  %s31_s23 = int_to_ptr.vmem [resolvable:$true] %s30_s23 }
   0x8   :  { %36 = dma.hbm_to_vmem [thread:$0]  %s29_s19, 2048, %s31_s23, [#allocation7], %s288_s20, %s288_s20, %s289_s21  }
   0x9   :  { %281 = dma.done.wait [#allocation4], 512  }
   0xa   :  { %282 = vsyncadd [#allocation4], 4294966784 }
   0xb   :  { %283 = dma.done.wait [#allocation7], 2048  }
   0xc   :  { %284 = vsyncadd [#allocation7], 4294965248  ;;  %v78_v0 = vld [vmem:[#allocation6 + $0x78] sm:$0xff]  ;;  %v77_v1 = vld [vmem:[#allocation6 + $0x70] sm:$0xff]  ;;  %s291_s24 = smov [#allocation8]   ;;  %s141_s28 = sshll.u32 %s336_s3, 4  ;;  %s142_s28 = int_to_ptr.hbm [resolvable:$true] %s141_s28 }
   0xd   :  { %156 = vmatpush.msra.mxu2 %v78_v0  ;;  %157 = vmatpush.msra.mxu3 %v78_v0  ;;  %v76_v2 = vld [vmem:[#allocation6 + $0x68] sm:$0xff]  ;;  %v75_v3 = vld [vmem:[#allocation6 + $0x60] sm:$0xff]  ;;  %v74_v4 = vld [vmem:[#allocation6 + $0x58] sm:$0xff]  ;;  %s139_s25 = sshll.u32 %s291_s24, 4  ;;  %s140_s25 = int_to_ptr.vmem [resolvable:$true] %s139_s25 }
   0xe   :  { %79 = vmatpush.msra.mxu0 %v78_v0  ;;  %155 = vmatpush.msra.mxu1 %v78_v0  ;;  %v73_v5 = vld [vmem:[#allocation6 + $0x50] sm:$0xff]  ;;  %v72_v6 = vld [vmem:[#allocation6 + $0x48] sm:$0xff]  ;;  %v71_v7 = vld [vmem:[#allocation6 + $0x40] sm:$0xff] }
   0xf   :  { %159 = vmatpush.msra.mxu2 %v77_v1  ;;  %160 = vmatpush.msra.mxu3 %v77_v1  ;;  %v70_v8 = vld [vmem:[#allocation6 + $0x38] sm:$0xff]  ;;  %v69_v9 = vld [vmem:[#allocation6 + $0x30] sm:$0xff]  ;;  %v68_v10 = vld [vmem:[#allocation6 + $0x28] sm:$0xff] }
  0x10   :  { %80 = vmatpush.msra.mxu0 %v77_v1  ;;  %158 = vmatpush.msra.mxu1 %v77_v1  ;;  %v67_v11 = vld [vmem:[#allocation6 + $0x20] sm:$0xff]  ;;  %v66_v12 = vld [vmem:[#allocation6 + $0x18] sm:$0xff]  ;;  %v65_v13 = vld [vmem:[#allocation6 + $0x10] sm:$0xff] }
  0x11   :  { %162 = vmatpush.msra.mxu2 %v76_v2  ;;  %163 = vmatpush.msra.mxu3 %v76_v2  ;;  %v64_v14 = vld [vmem:[#allocation6 + $0x8] sm:$0xff]  ;;  %v63_v15 = vld [vmem:[#allocation6] sm:$0xff]  ;;  %v61_v16 = vld [vmem:[#allocation3 + $0x10] sm:$0xff] }
  0x12   :  { %81 = vmatpush.msra.mxu0 %v76_v2  ;;  %161 = vmatpush.msra.mxu1 %v76_v2  ;;  %v62_v17 = vld [vmem:[#allocation3 + $0x18] sm:$0xff]  ;;  %v59_v18 = vld [vmem:[#allocation3] sm:$0xff]  ;;  %v60_v19 = vld [vmem:[#allocation3 + $0x8] sm:$0xff] }
  0x13   :  { %165 = vmatpush.msra.mxu2 %v75_v3  ;;  %166 = vmatpush.msra.mxu3 %v75_v3  ;;  %v208_v20 = vld [vmem:[%s335_s2] ss:$0 sm:$0xff] }
  0x14   :  { %82 = vmatpush.msra.mxu0 %v75_v3  ;;  %164 = vmatpush.msra.mxu1 %v75_v3 }
  0x15   :  { %168 = vmatpush.msra.mxu2 %v74_v4  ;;  %169 = vmatpush.msra.mxu3 %v74_v4 }
  0x16   :  { %83 = vmatpush.msra.mxu0 %v74_v4  ;;  %167 = vmatpush.msra.mxu1 %v74_v4 }
  0x17   :  { %171 = vmatpush.msra.mxu2 %v73_v5  ;;  %172 = vmatpush.msra.mxu3 %v73_v5 }
  0x18   :  { %84 = vmatpush.msra.mxu0 %v73_v5  ;;  %170 = vmatpush.msra.mxu1 %v73_v5 }
  0x19   :  { %174 = vmatpush.msra.mxu2 %v72_v6  ;;  %175 = vmatpush.msra.mxu3 %v72_v6 }
  0x1a   :  { %85 = vmatpush.msra.mxu0 %v72_v6  ;;  %173 = vmatpush.msra.mxu1 %v72_v6 }
  0x1b   :  { %177 = vmatpush.msra.mxu2 %v71_v7  ;;  %178 = vmatpush.msra.mxu3 %v71_v7 }
  0x1c   :  { %86 = vmatpush.msra.mxu0 %v71_v7  ;;  %176 = vmatpush.msra.mxu1 %v71_v7 }
  0x1d   :  { %180 = vmatpush.msra.mxu2 %v70_v8  ;;  %181 = vmatpush.msra.mxu3 %v70_v8 }
  0x1e   :  { %87 = vmatpush.msra.mxu0 %v70_v8  ;;  %179 = vmatpush.msra.mxu1 %v70_v8 }
  0x1f   :  { %183 = vmatpush.msra.mxu2 %v69_v9  ;;  %184 = vmatpush.msra.mxu3 %v69_v9 }
  0x20   :  { %88 = vmatpush.msra.mxu0 %v69_v9  ;;  %182 = vmatpush.msra.mxu1 %v69_v9 }
  0x21   :  { %186 = vmatpush.msra.mxu2 %v68_v10  ;;  %187 = vmatpush.msra.mxu3 %v68_v10 }
  0x22   :  { %89 = vmatpush.msra.mxu0 %v68_v10  ;;  %185 = vmatpush.msra.mxu1 %v68_v10 }
  0x23   :  { %189 = vmatpush.msra.mxu2 %v67_v11  ;;  %190 = vmatpush.msra.mxu3 %v67_v11 }
  0x24   :  { %90 = vmatpush.msra.mxu0 %v67_v11  ;;  %188 = vmatpush.msra.mxu1 %v67_v11 }
  0x25   :  { %192 = vmatpush.msra.mxu2 %v66_v12  ;;  %193 = vmatpush.msra.mxu3 %v66_v12 }
  0x26   :  { %91 = vmatpush.msra.mxu0 %v66_v12  ;;  %191 = vmatpush.msra.mxu1 %v66_v12 }
  0x27   :  { %195 = vmatpush.msra.mxu2 %v65_v13  ;;  %196 = vmatpush.msra.mxu3 %v65_v13 }
  0x28   :  { %92 = vmatpush.msra.mxu0 %v65_v13  ;;  %194 = vmatpush.msra.mxu1 %v65_v13 }
  0x29   :  { %198 = vmatpush.msra.mxu2 %v64_v14  ;;  %199 = vmatpush.msra.mxu3 %v64_v14 }
  0x2a   :  { %93 = vmatpush.msra.mxu0 %v64_v14  ;;  %197 = vmatpush.msra.mxu1 %v64_v14 }
  0x2b   :  { %201 = vmatpush.msra.mxu2 %v63_v15  ;;  %202 = vmatpush.msra.mxu3 %v63_v15 }
  0x2c   :  { %101 = vmatmul.f32.vlgmr.msra.gmra.mxu2 %v61_v16  ;;  %104 = vmatmul.f32.vlgmr.msra.gmra.mxu3 %v62_v17 }
  0x2d   :  { %94 = vmatpush.msra.mxu0 %v63_v15  ;;  %200 = vmatpush.msra.mxu1 %v63_v15 }
  0x2e   :  { %95 = vmatmul.f32.vlgmr.msra.gmra.mxu0 %v59_v18  ;;  %98 = vmatmul.f32.vlgmr.msra.gmra.mxu1 %v60_v19 }
  0xab   :  { %v96_v21 = vpop.f32.mrf.mxu0  ;;  %v99_v22 = vpop.f32.mrf.mxu1 }
  0xac   :  { %v127_v23 = vadd.f32 %v208_v20, %v96_v21  ;;  %v128_v24 = vadd.f32 %v208_v20, %v99_v22 }
  0xae   :  { %131 = vst [vmem:[#allocation8] sm:$0xff] %v127_v23 }
  0xaf   :  { %132 = vst [vmem:[#allocation8 + $0x8] sm:$0xff] %v128_v24  ;;  %v102_v25 = vpop.f32.mrf.mxu2  ;;  %v105_v26 = vpop.f32.mrf.mxu3 }
  0xb0   :  { %v129_v27 = vadd.f32 %v208_v20, %v102_v25  ;;  %v130_v28 = vadd.f32 %v208_v20, %v105_v26 }
  0xb2   :  { %133 = vst [vmem:[#allocation8 + $0x10] sm:$0xff] %v129_v27 }
  0xb3   :  { %134 = vst [vmem:[#allocation8 + $0x18] sm:$0xff] %v130_v28 }
  0xb4   :  { %147 = dma.vmem_to_hbm [thread:$0]  %s140_s25, 512, %s142_s28, [#allocation5], %s288_s20, %s288_s20, %s289_s21  }
  0xb5   :  { %285 = dma.done.wait [#allocation5], 512  }
  0xb6   :  { %286 = vsyncadd [#allocation5], 4294966784 }
  0xb7   :  { %152 = vsyncpa [#allocation4], 1 }
  0xb8   :  { %153 = vsyncpa [#allocation7], 1 }
  0xb9   :  { %154 = vsyncpa [#allocation5], 1 }

</bundles_post_ra>
